<compile_context>
chip_gen: v7x
topology: tpu7x:2x2x1
jax: 0.10.0
libtpu: 0.0.40
codegen_flags: <defaults>
</compile_context>

<pallas_src>
import functools

import jax
import jax.numpy as jnp
from jax import lax
from jax.experimental import pallas as pl
from jax.experimental.pallas import tpu as pltpu

LANES = 128
MAX_TILE_BYTES = 2 * 1024 * 1024  # 2 MiB per input block per step


def _round_up(x, m):
    return ((x + m - 1) // m) * m


def _pick_acc_rows(tile_rows):
    """Largest accumulator row-count (multiple of 8) that divides tile_rows."""
    for cand in (64, 32, 16, 8):
        if tile_rows % cand == 0:
            return cand
    return 8


def _multi_loss_kernel(x_ref, t_ref, sq_out_ref, ab_out_ref,
                       acc_sq_ref, acc_ab_ref, *,
                       rows, tile_rows, acc_rows, tiles_per_split, need_mask):
    """Accumulate per-lane partial sums of (x-t)^2 and |x-t|.

    x_ref, t_ref      : VMEM (tile_rows, 128) tiles (native dtype)
    sq_out_ref        : VMEM (1, 8, 128) per-split folded partials of sum((x-t)^2)
    ab_out_ref        : VMEM (1, 8, 128) per-split folded partials of sum(|x-t|)
    acc_sq_ref/ab_ref : VMEM (acc_rows, 128) f32 small vector accumulators
    """
    s = pl.program_id(0)  # split (parallel)
    i = pl.program_id(1)  # tile within split (arbitrary / reduction)

    @pl.when(i == 0)
    def _init():
        acc_sq_ref[...] = jnp.zeros_like(acc_sq_ref)
        acc_ab_ref[...] = jnp.zeros_like(acc_ab_ref)

    d = x_ref[...].astype(jnp.float32) - t_ref[...].astype(jnp.float32)

    def accumulate(dd):
        # Per-step partial reduce of the whole tile into a few vregs, then a
        # single small += into the VMEM accumulator (no full-tile RMW).
        acc_sq_ref[...] += (dd * dd).reshape(-1, acc_rows, LANES).sum(axis=0)
        acc_ab_ref[...] += jnp.abs(dd).reshape(-1, acc_rows, LANES).sum(axis=0)

    if need_mask:
        # Only the globally-last tile can run past the true end of the data;
        # apply the (iota, compare, select) mask only on that step.
        is_tail = jnp.logical_and(s == pl.num_programs(0) - 1,
                                  i == tiles_per_split - 1)

        @pl.when(is_tail)
        def _tail():
            row_start = (s * tiles_per_split + i) * tile_rows
            row_ids = row_start + lax.broadcasted_iota(
                jnp.int32, (tile_rows, LANES), 0)
            accumulate(jnp.where(row_ids < rows, d, 0.0))

        @pl.when(jnp.logical_not(is_tail))
        def _body():
            accumulate(d)
    else:
        accumulate(d)

    @pl.when(i == tiles_per_split - 1)
    def _finalize():
        g = acc_rows // 8
        sq_out_ref[0] = acc_sq_ref[...].reshape(g, 8, LANES).sum(axis=0)
        ab_out_ref[0] = acc_ab_ref[...].reshape(g, 8, LANES).sum(axis=0)


def multi_loss(x, t, weights, *, min_pallas_elems=100_000):
    """Weighted sum of [MSE, L1] losses between x and t (same shape)."""
    assert x.shape == t.shape
    n = x.size
    w = weights.astype(jnp.float32)

    if n < min_pallas_elems:
        # Tiny inputs: pallas_call launch + pipeline priming dominates; plain
        # fused XLA is strictly faster.
        d = x.astype(jnp.float32) - t.astype(jnp.float32)
        return w[0] * jnp.mean(d * d) + w[1] * jnp.mean(jnp.abs(d))

    itemsize = x.dtype.itemsize
    pack = 32 // itemsize          # sublane packing: 8 (f32), 16 (bf16), 32 (i8)
    max_rows = MAX_TILE_BYTES // (LANES * itemsize)

    # Flatten (free for contiguous arrays). Only pad when numel is not a
    # multiple of 128 -- zero padding contributes 0 to both sums.
    flat_x = x.reshape(-1)
    flat_t = t.reshape(-1)
    pad = (-n) % LANES
    if pad:
        flat_x = jnp.pad(flat_x, (0, pad))
        flat_t = jnp.pad(flat_t, (0, pad))

    rows = flat_x.size // LANES
    x2 = flat_x.reshape(rows, LANES)
    t2 = flat_t.reshape(rows, LANES)

    # Tile sizing: large streaming tile, dtype-aware sublane rounding.
    tile_rows = min(max_rows, _round_up(rows, pack))
    acc_rows = _pick_acc_rows(tile_rows)
    n_tiles = (rows + tile_rows - 1) // tile_rows

    # 2-way split (v7x megacore) only when it divides evenly, so no clamped /
    # duplicated tail tile can ever occur.
    n_split = 2 if (n_tiles >= 2 and n_tiles % 2 == 0) else 1
    tiles_per_split = n_tiles // n_split
    assert n_split * tiles_per_split == n_tiles

    covered_rows = n_tiles * tile_rows
    need_mask = covered_rows != rows      # only the global tail tile is partial

    def in_idx(s, i):
        return (s * tiles_per_split + i, 0)

    kernel = functools.partial(
        _multi_loss_kernel,
        rows=rows,
        tile_rows=tile_rows,
        acc_rows=acc_rows,
        tiles_per_split=tiles_per_split,
        need_mask=need_mask,
    )

    grid_spec = pltpu.PrefetchScalarGridSpec(
        num_scalar_prefetch=0,
        grid=(n_split, tiles_per_split),
        in_specs=[
            pl.BlockSpec((tile_rows, LANES), in_idx),
            pl.BlockSpec((tile_rows, LANES), in_idx),
        ],
        out_specs=[
            pl.BlockSpec((1, 8, LANES), lambda s, i: (s, 0, 0)),
            pl.BlockSpec((1, 8, LANES), lambda s, i: (s, 0, 0)),
        ],
        scratch_shapes=[
            pltpu.VMEM((acc_rows, LANES), jnp.float32),
            pltpu.VMEM((acc_rows, LANES), jnp.float32),
        ],
    )

    cost = pl.CostEstimate(
        flops=5 * n,                     # sub, mul, add, abs, add per element
        transcendentals=0,
        bytes_accessed=2 * n * itemsize + 2 * n_split * 8 * LANES * 4,
    )

    sq_part, ab_part = pl.pallas_call(
        kernel,
        grid_spec=grid_spec,
        out_shape=(
            jax.ShapeDtypeStruct((n_split, 8, LANES), jnp.float32),
            jax.ShapeDtypeStruct((n_split, 8, LANES), jnp.float32),
        ),
        compiler_params=pltpu.CompilerParams(
            dimension_semantics=("parallel", "arbitrary"),
            # On v7x one could raise MAX_TILE_BYTES to 4 MiB and set
            # vmem_limit_bytes=36<<20 here; 2 MiB blocks keep v5e's 16 MiB
            # default scoped VMEM safe without any override.
        ),
        cost_estimate=cost,
    )(x2, t2)

    # Final (tiny) combine in the wrapper: mean + weighted sum.
    inv_n = 1.0 / float(n)
    mse = jnp.sum(sq_part) * inv_n
    mae = jnp.sum(ab_part) * inv_n
    return w[0] * mse + w[1] * mae


def _reference(x, t, weights):
    d = x.astype(jnp.float32) - t.astype(jnp.float32)
    w = weights.astype(jnp.float32)
    return w[0] * jnp.mean(d * d) + w[1] * jnp.mean(jnp.abs(d))


if __name__ == "__main__":
    key = jax.random.PRNGKey(0)
    kx, kt, ku, kv = jax.random.split(key, 4)

    # Deterministic loss weights (MultiLoss.__init__ weights tensor)
    weights = jnp.array([0.5, 2.0], dtype=jnp.float32)

    # NCHW inputs, small shapes; force the Pallas path so the kernel runs.
    X = jax.random.normal(kx, (2, 4, 16, 16), dtype=jnp.float32)
    T = jax.random.normal(kt, (2, 4, 16, 16), dtype=jnp.float32)
    total = multi_loss(X, T, weights, min_pallas_elems=0)
    total = jax.block_until_ready(total)
    ref = _reference(X, T, weights)
    assert jnp.allclose(total, ref, rtol=1e-5, atol=1e-5), (total, ref)

    # Second small case with a ragged element count to exercise the masked
    # tail-tile path.
    X2 = jax.random.normal(ku, (2, 3, 17, 16), dtype=jnp.float32)
    T2 = jax.random.normal(kv, (2, 3, 17, 16), dtype=jnp.float32)
    total2 = multi_loss(X2, T2, weights, min_pallas_elems=0)
    total2 = jax.block_until_ready(total2)
    ref2 = _reference(X2, T2, weights)
    assert jnp.allclose(total2, ref2, rtol=1e-5, atol=1e-5), (total2, ref2)

    print("KERNEL_OK")
</pallas_src>

<mosaic_0001>
module attributes {stable_mosaic.version = 11 : i64} {
  func.func @_multi_loss_kernel(%arg0: i32, %arg1: i32, %arg2: memref<16x128xf32, #tpu.memory_space<vmem>>, %arg3: memref<16x128xf32, #tpu.memory_space<vmem>>, %arg4: memref<1x8x128xf32, #tpu.memory_space<vmem>>, %arg5: memref<1x8x128xf32, #tpu.memory_space<vmem>>, %arg6: memref<16x128xf32, #tpu.memory_space<vmem>>, %arg7: memref<16x128xf32, #tpu.memory_space<vmem>>) attributes {dimension_semantics = [#tpu.dimension_semantics<parallel>, #tpu.dimension_semantics<arbitrary>], iteration_bounds = array<i64: 1, 1>, scalar_prefetch = 0 : i64, scratch_operands = 2 : i64, tpu.core_type = #tpu.core_type<tc>, window_params = [{transform_indices = @transform_0, window_bounds = array<i64: 16, 128>}, {transform_indices = @transform_1, window_bounds = array<i64: 16, 128>}, {transform_indices = @transform_2, window_bounds = array<i64: 1, 8, 128>}, {transform_indices = @transform_3, window_bounds = array<i64: 1, 8, 128>}]} {
    %c0_i32 = arith.constant 0 : i32
    %0 = arith.cmpi eq, %arg1, %c0_i32 : i32
    %1 = arith.extui %0 : i1 to i32
    %c0_i32_0 = arith.constant 0 : i32
    %2 = arith.cmpi ne, %1, %c0_i32_0 : i32
    scf.if %2 {
      %cst_15 = arith.constant 0.000000e+00 : f32
      %21 = vector.broadcast %cst_15 : f32 to vector<16x128xf32>
      %c0_16 = arith.constant 0 : index
      %c0_17 = arith.constant 0 : index
      %22 = vector.load %arg6[%c0_16, %c0_17] : memref<16x128xf32, #tpu.memory_space<vmem>>, vector<16x128xf32>
      tpu.vector_store %arg6[%c0_16, %c0_17], %21 {strides = array<i32>} : memref<16x128xf32, #tpu.memory_space<vmem>>, vector<16x128xf32>,
      %cst_18 = arith.constant 0.000000e+00 : f32
      %23 = vector.broadcast %cst_18 : f32 to vector<16x128xf32>
      %c0_19 = arith.constant 0 : index
      %c0_20 = arith.constant 0 : index
      %24 = vector.load %arg7[%c0_19, %c0_20] : memref<16x128xf32, #tpu.memory_space<vmem>>, vector<16x128xf32>
      tpu.vector_store %arg7[%c0_19, %c0_20], %23 {strides = array<i32>} : memref<16x128xf32, #tpu.memory_space<vmem>>, vector<16x128xf32>,
    } else {
    }
    %c0 = arith.constant 0 : index
    %c0_1 = arith.constant 0 : index
    %3 = vector.load %arg2[%c0, %c0_1] : memref<16x128xf32, #tpu.memory_space<vmem>>, vector<16x128xf32>
    %c0_2 = arith.constant 0 : index
    %c0_3 = arith.constant 0 : index
    %4 = vector.load %arg3[%c0_2, %c0_3] : memref<16x128xf32, #tpu.memory_space<vmem>>, vector<16x128xf32>
    %5 = arith.subf %3, %4 : vector<16x128xf32>
    %c0_4 = arith.constant 0 : index
    %c0_5 = arith.constant 0 : index
    %6 = vector.load %arg6[%c0_4, %c0_5] : memref<16x128xf32, #tpu.memory_space<vmem>>, vector<16x128xf32>
    %7 = arith.mulf %5, %5 : vector<16x128xf32>
    %8 = vector.shape_cast %7 : vector<16x128xf32> to vector<1x16x128xf32>
    %cst = arith.constant dense<0.000000e+00> : vector<16x128xf32>
    %9 = vector.multi_reduction <add>, %8, %cst [0] : vector<1x16x128xf32> to vector<16x128xf32>
    %10 = arith.addf %6, %9 : vector<16x128xf32>
    %c0_6 = arith.constant 0 : index
    %c0_7 = arith.constant 0 : index
    %11 = vector.load %arg6[%c0_6, %c0_7] : memref<16x128xf32, #tpu.memory_space<vmem>>, vector<16x128xf32>
    tpu.vector_store %arg6[%c0_6, %c0_7], %10 {strides = array<i32>} : memref<16x128xf32, #tpu.memory_space<vmem>>, vector<16x128xf32>,
    %c0_8 = arith.constant 0 : index
    %c0_9 = arith.constant 0 : index
    %12 = vector.load %arg7[%c0_8, %c0_9] : memref<16x128xf32, #tpu.memory_space<vmem>>, vector<16x128xf32>
    %13 = math.absf %5 : vector<16x128xf32>
    %14 = vector.shape_cast %13 : vector<16x128xf32> to vector<1x16x128xf32>
    %cst_10 = arith.constant dense<0.000000e+00> : vector<16x128xf32>
    %15 = vector.multi_reduction <add>, %14, %cst_10 [0] : vector<1x16x128xf32> to vector<16x128xf32>
    %16 = arith.addf %12, %15 : vector<16x128xf32>
    %c0_11 = arith.constant 0 : index
    %c0_12 = arith.constant 0 : index
    %17 = vector.load %arg7[%c0_11, %c0_12] : memref<16x128xf32, #tpu.memory_space<vmem>>, vector<16x128xf32>
    tpu.vector_store %arg7[%c0_11, %c0_12], %16 {strides = array<i32>} : memref<16x128xf32, #tpu.memory_space<vmem>>, vector<16x128xf32>,
    %c0_i32_13 = arith.constant 0 : i32
    %18 = arith.cmpi eq, %arg1, %c0_i32_13 : i32
    %19 = arith.extui %18 : i1 to i32
    %c0_i32_14 = arith.constant 0 : i32
    %20 = arith.cmpi ne, %19, %c0_i32_14 : i32
    scf.if %20 {
      %c0_15 = arith.constant 0 : index
      %c0_16 = arith.constant 0 : index
      %21 = vector.load %arg6[%c0_15, %c0_16] : memref<16x128xf32, #tpu.memory_space<vmem>>, vector<16x128xf32>
      %22 = vector.shape_cast %21 : vector<16x128xf32> to vector<2x8x128xf32>
      %cst_17 = arith.constant dense<0.000000e+00> : vector<8x128xf32>
      %23 = vector.multi_reduction <add>, %22, %cst_17 [0] : vector<2x8x128xf32> to vector<8x128xf32>
      %c0_18 = arith.constant 0 : index
      %c0_19 = arith.constant 0 : index
      %c0_20 = arith.constant 0 : index
      %24 = vector.load %arg4[%c0_18, %c0_19, %c0_20] : memref<1x8x128xf32, #tpu.memory_space<vmem>>, vector<1x8x128xf32>
      %25 = vector.shape_cast %24 : vector<1x8x128xf32> to vector<8x128xf32>
      %26 = vector.shape_cast %23 : vector<8x128xf32> to vector<1x8x128xf32>
      tpu.vector_store %arg4[%c0_18, %c0_19, %c0_20], %26 {strides = array<i32>} : memref<1x8x128xf32, #tpu.memory_space<vmem>>, vector<1x8x128xf32>,
      %c0_21 = arith.constant 0 : index
      %c0_22 = arith.constant 0 : index
      %27 = vector.load %arg7[%c0_21, %c0_22] : memref<16x128xf32, #tpu.memory_space<vmem>>, vector<16x128xf32>
      %28 = vector.shape_cast %27 : vector<16x128xf32> to vector<2x8x128xf32>
      %cst_23 = arith.constant dense<0.000000e+00> : vector<8x128xf32>
      %29 = vector.multi_reduction <add>, %28, %cst_23 [0] : vector<2x8x128xf32> to vector<8x128xf32>
      %c0_24 = arith.constant 0 : index
      %c0_25 = arith.constant 0 : index
      %c0_26 = arith.constant 0 : index
      %30 = vector.load %arg5[%c0_24, %c0_25, %c0_26] : memref<1x8x128xf32, #tpu.memory_space<vmem>>, vector<1x8x128xf32>
      %31 = vector.shape_cast %30 : vector<1x8x128xf32> to vector<8x128xf32>
      %32 = vector.shape_cast %29 : vector<8x128xf32> to vector<1x8x128xf32>
      tpu.vector_store %arg5[%c0_24, %c0_25, %c0_26], %32 {strides = array<i32>} : memref<1x8x128xf32, #tpu.memory_space<vmem>>, vector<1x8x128xf32>,
    } else {
    }
    return
  }
  func.func @transform_0(%arg0: i32, %arg1: i32) -> (i32, i32) {
    %c1_i32 = arith.constant 1 : i32
    %0 = arith.muli %arg0, %c1_i32 : i32
    %1 = arith.addi %0, %arg1 : i32
    %c0_i32 = arith.constant 0 : i32
    %c0_i32_0 = arith.constant 0 : i32
    return %1, %c0_i32 : i32, i32
  }
  func.func @transform_1(%arg0: i32, %arg1: i32) -> (i32, i32) {
    %c1_i32 = arith.constant 1 : i32
    %0 = arith.muli %arg0, %c1_i32 : i32
    %1 = arith.addi %0, %arg1 : i32
    %c0_i32 = arith.constant 0 : i32
    %c0_i32_0 = arith.constant 0 : i32
    return %1, %c0_i32 : i32, i32
  }
  func.func @transform_2(%arg0: i32, %arg1: i32) -> (i32, i32, i32) {
    %c0_i32 = arith.constant 0 : i32
    %c0_i32_0 = arith.constant 0 : i32
    %c0_i32_1 = arith.constant 0 : i32
    return %arg0, %c0_i32, %c0_i32_0 : i32, i32, i32
  }
  func.func @transform_3(%arg0: i32, %arg1: i32) -> (i32, i32, i32) {
    %c0_i32 = arith.constant 0 : i32
    %c0_i32_0 = arith.constant 0 : i32
    %c0_i32_1 = arith.constant 0 : i32
    return %arg0, %c0_i32, %c0_i32_0 : i32, i32, i32
  }
}

</mosaic_0001>

<bundles_post_ra>
// kernel: tpu_custom_call.1
= control target key start
LH: loop header
LB: loop body
LE: loop exit
PB: predicated region body
PF: predicated region fallthrough
CT: control target
= control target key end

     0   :  { %9 = vsyncpa [#allocation5], 0  ;;  %s306_s0 = inlined_call_operand.hbm [shape: f32[16,128], index: 0, kind: input, shape index: {}]   ;;  %s307_s1 = inlined_call_operand.hbm [shape: f32[16,128], index: 1, kind: input, shape index: {}]   ;;  %s308_s2 = inlined_call_operand.hbm [shape: f32[1,8,128], index: 2, kind: output, shape index: {0}]   ;;  %s309_s3 = inlined_call_operand.hbm [shape: f32[1,8,128], index: 3, kind: output, shape index: {1}]  }
   0x1   :  { %10 = vsyncpa [#allocation8], 0 }
   0x2   :  { %11 = vsyncpa [#allocation6], 0 }
   0x3   :  { %12 = vsyncpa [#allocation11], 0  ;;  %s232_s12 = smov [#allocation4]   ;;  %s136_s16 = scalar_lea.hbm %s306_s0, 256 }
   0x4   :  { %s22_s13 = sshll.u32 %s232_s12, 4  ;;  %p137_p0 = scmp.ne.s32.totalorder %s306_s0, %s136_s16  ;;  %s23_s13 = int_to_ptr.vmem [resolvable:$true] %s22_s13 }
   0x5   :  { %p140_p1 = scmp.lt.u32.totalorder %s136_s16, %s306_s0 }
   0x7   :  { %p142_p2 = pnand %p140_p1, %p137_p0 }
   0x9   :  { %145 = shalt.err (!%p142_p2)
}
   0xa   :  { %s146_s21 = scalar_lea.vmem %s23_s13, 256  ;;  %p151_p4 = scmp.lt.s32.totalorder %s23_s13, %s23_s13 }
   0xb   :  { %p147_p3 = scmp.ne.s32.totalorder %s23_s13, %s146_s21  ;;  %p152_p5 = scmp.lt.s32.totalorder %s146_s21, %s146_s21 }
   0xd   :  { %p153_p6 = por %p152_p5, %p151_p4 }
   0xf   :  { %p154_p7 = pnand %p153_p6, %p147_p3 }
  0x11   :  { %157 = shalt.err (!%p154_p7)
}
  0x12   :  { %s233_s22 = smov 128   ;;  %s234_s23 = smov 8  }
  0x13   :  { %28 = dma.hbm_to_vmem [thread:$0]  %s306_s0, 256, %s23_s13, [#allocation5], %s233_s22, %s233_s22, %s234_s23  }
  0x14   :  { %s235_s26 = smov [#allocation7]   ;;  %s158_s30 = scalar_lea.hbm %s307_s1, 256 }
  0x15   :  { %s38_s27 = sshll.u32 %s235_s26, 4  ;;  %p159_p8 = scmp.ne.s32.totalorder %s307_s1, %s158_s30  ;;  %s39_s27 = int_to_ptr.vmem [resolvable:$true] %s38_s27 }
  0x16   :  { %p162_p9 = scmp.lt.u32.totalorder %s158_s30, %s307_s1 }
  0x18   :  { %p164_p10 = pnand %p162_p9, %p159_p8 }
  0x1a   :  { %167 = shalt.err (!%p164_p10)
}
  0x1b   :  { %s168_s8 = scalar_lea.vmem %s39_s27, 256  ;;  %p173_p12 = scmp.lt.s32.totalorder %s39_s27, %s39_s27 }
  0x1c   :  { %p169_p11 = scmp.ne.s32.totalorder %s39_s27, %s168_s8  ;;  %p174_p13 = scmp.lt.s32.totalorder %s168_s8, %s168_s8 }
  0x1e   :  { %p175_p0 = por %p174_p13, %p173_p12 }
  0x20   :  { %p176_p1 = pnand %p175_p0, %p169_p11 }
  0x22   :  { %179 = shalt.err (!%p176_p1)
}
  0x23   :  { %44 = dma.hbm_to_vmem [thread:$0]  %s307_s1, 256, %s39_s27, [#allocation8], %s233_s22, %s233_s22, %s234_s23  }
  0x24   :  { %224 = dma.done.wait [#allocation5], 256  }
  0x25   :  { %225 = vsyncadd [#allocation5], 4294967040 }
  0x26   :  { %226 = dma.done.wait [#allocation8], 256  }
  0x27   :  { %227 = vsyncadd [#allocation8], 4294967040  ;;  %v63_v0 = vld [vmem:[#allocation4] sm:$0xff]  ;;  %v64_v1 = vld [vmem:[#allocation4 + $0x8] sm:$0xff]  ;;  %s236_s10 = smov [#allocation9]   ;;  %s237_s12 = smov [#allocation10]  }
  0x28   :  { %v65_v2 = vld [vmem:[#allocation7] sm:$0xff]  ;;  %v66_v3 = vld [vmem:[#allocation7 + $0x8] sm:$0xff]  ;;  %s106_s11 = sshll.u32 %s236_s10, 4  ;;  %s116_s13 = sshll.u32 %s237_s12, 4  ;;  %s107_s11 = int_to_ptr.vmem [resolvable:$true] %s106_s11  ;;  %s117_s13 = int_to_ptr.vmem [resolvable:$true] %s116_s13 }
  0x29   :  { %v67_v4 = vsub.f32 %v63_v0, %v65_v2  ;;  %v68_v5 = vsub.f32 %v64_v1, %v66_v3  ;;  %s180_s1 = scalar_lea.vmem %s107_s11, 128  ;;  %p185_p3 = scmp.lt.s32.totalorder %s107_s11, %s107_s11 }
  0x2a   :  { %p181_p2 = scmp.ne.s32.totalorder %s107_s11, %s180_s1  ;;  %p186_p4 = scmp.lt.s32.totalorder %s180_s1, %s180_s1 }
  0x2b   :  { %v71_v6 = vmul.f32 %v67_v4, %v67_v4  ;;  %v81_v7 = vand.u32 2147483647, %v67_v4  ;;  %v72_v8 = vmul.f32 %v68_v5, %v68_v5  ;;  %v82_v9 = vand.u32 2147483647, %v68_v5 }
  0x2c   :  { %p187_p5 = por %p186_p4, %p185_p3 }
  0x2d   :  { %v94_v10 = vadd.f32 %v72_v8, %v71_v6  ;;  %v98_v11 = vadd.f32 %v82_v9, %v81_v7 }
  0x2e   :  { %p188_p6 = pnand %p187_p5, %p181_p2 }
  0x2f   :  { %95 = vst [vmem:[#allocation9] sm:$0xff] %v94_v10  ;;  %99 = vst [vmem:[#allocation10] sm:$0xff] %v98_v11 }
  0x30   :  { %191 = shalt.err (!%p188_p6)
}
  0x31   :  { %s192_s16 = scalar_lea.hbm %s308_s2, 128 }
  0x32   :  { %p193_p7 = scmp.ne.s32.totalorder %s308_s2, %s192_s16  ;;  %p196_p8 = scmp.lt.u32.totalorder %s192_s16, %s308_s2 }
  0x34   :  { %p198_p9 = pnand %p196_p8, %p193_p7 }
  0x36   :  { %201 = shalt.err (!%p198_p9)
}
  0x37   :  { %109 = dma.vmem_to_hbm [thread:$0]  %s107_s11, 128, %s308_s2, [#allocation6]  }
  0x38   :  { %s202_s23 = scalar_lea.vmem %s117_s13, 128  ;;  %p207_p11 = scmp.lt.s32.totalorder %s117_s13, %s117_s13 }
  0x39   :  { %p203_p10 = scmp.ne.s32.totalorder %s117_s13, %s202_s23  ;;  %p208_p12 = scmp.lt.s32.totalorder %s202_s23, %s202_s23 }
  0x3b   :  { %p209_p13 = por %p208_p12, %p207_p11 }
  0x3d   :  { %p210_p0 = pnand %p209_p13, %p203_p10 }
  0x3f   :  { %213 = shalt.err (!%p210_p0)
}
  0x40   :  { %s214_s26 = scalar_lea.hbm %s309_s3, 128 }
  0x41   :  { %p215_p1 = scmp.ne.s32.totalorder %s309_s3, %s214_s26  ;;  %p218_p2 = scmp.lt.u32.totalorder %s214_s26, %s309_s3 }
  0x43   :  { %p220_p3 = pnand %p218_p2, %p215_p1 }
  0x45   :  { %223 = shalt.err (!%p220_p3)
}
  0x46   :  { %119 = dma.vmem_to_hbm [thread:$0]  %s117_s13, 128, %s309_s3, [#allocation11]  }
  0x47   :  { %228 = dma.done.wait [#allocation6], 128  }
  0x48   :  { %229 = vsyncadd [#allocation6], 4294967168 }
  0x49   :  { %230 = dma.done.wait [#allocation11], 128  }
  0x4a   :  { %231 = vsyncadd [#allocation11], 4294967168 }
  0x4b   :  { %126 = vsyncpa [#allocation5], 1 }
  0x4c   :  { %127 = vsyncpa [#allocation8], 1 }
  0x4d   :  { %128 = vsyncpa [#allocation6], 1 }
  0x4e   :  { %129 = vsyncpa [#allocation11], 1 }

</bundles_post_ra>
